<compile_context>
chip_gen: v7x
topology: tpu7x:2x2x1
jax: 0.10.0
libtpu: 0.0.40
codegen_flags: <defaults>
</compile_context>

<pallas_src>
import math

import jax
import jax.numpy as jnp
from jax.experimental import pallas as pl
from jax.experimental.pallas import tpu as pltpu

CHANNELS = 4
W_IN = 3
H_IN = 8
NUM_CLASSES = 7
BN_EPS = 1e-5

_LANES_OUT = 128          # lane-dense output width (>= num_classes)
_MAX_TILE = 256           # samples per grid step (upper bound)


# ----------------------------------------------------------------------------
# Fused kernel
# ----------------------------------------------------------------------------
def _fused_forward_kernel(p1_ref, w1_ref, b1_ref, a1_ref,
                          w2_ref, b2_ref, a2_ref,
                          wfc_ref, bfc_ref, a3_ref,
                          wout_ref, bout_ref, out_ref):
    """Whole forward for one batch tile.

    p1_ref : (18*tb, 16) bf16 conv1 im2col patches, rows ordered
             (pool-parity, pool1-position (3x3), sample), cols (ci, ki, kj).
    out_ref: (tb, 128) f32 softmax probabilities (lanes >= num_classes are 0).
    """
    tb = out_ref.shape[0]
    half = 9 * tb                                   # rows per pooling parity

    # ---- stage 1: conv1 (BN1 folded into w1) + MaxPool(1,2) + PReLU1 --------
    y1 = jnp.dot(p1_ref[...], w1_ref[...],
                 preferred_element_type=jnp.float32)          # (18*tb, 32)
    raw1 = jnp.maximum(y1[:half, :], y1[half:, :])            # pool over width pair
    z1 = raw1 + b1_ref[...]                                   # folded BN bias
    pool1 = jnp.where(z1 >= 0.0, z1, a1_ref[...] * z1)        # (9*tb, 32), rows=(pos,t)

    def pos_blk(p2, p3):                                      # pool1 at spatial (p2,p3)
        s = (p2 * 3 + p3) * tb
        return pool1[s:s + tb, :]                             # (tb, 32) static slice

    # ---- stage 2: conv2 as 4 per-tap matmuls on VMEM-resident pool1 ---------
    # LHS of each tap stacks the 4 pool2-window positions (u,v) along rows.
    uv = ((0, 0), (0, 1), (1, 0), (1, 1))
    parts = []
    for tap, (ki, kj) in enumerate(((0, 0), (0, 1), (1, 0), (1, 1))):
        lhs = jnp.concatenate([pos_blk(u + ki, v + kj) for (u, v) in uv], axis=0)
        parts.append(jnp.dot(lhs, w2_ref[tap],
                             preferred_element_type=jnp.float32))   # (4*tb, 64)
    raw2 = parts[0] + parts[1] + parts[2] + parts[3]
    # MaxPool(2,2) over the 4 (u,v) positions, then folded-BN bias + PReLU2.
    m2 = jnp.maximum(jnp.maximum(raw2[0:tb], raw2[tb:2 * tb]),
                     jnp.maximum(raw2[2 * tb:3 * tb], raw2[3 * tb:4 * tb]))
    z2 = m2 + b2_ref[...]
    y2 = jnp.where(z2 >= 0.0, z2, a2_ref[...] * z2)           # (tb, 64) == flatten

    # ---- stage 3: fc1 (BN3 folded) + PReLU3 + output Linear + softmax -------
    h = jnp.dot(y2, wfc_ref[...], preferred_element_type=jnp.float32) + bfc_ref[...]
    h = jnp.where(h >= 0.0, h, a3_ref[...] * h)
    logits = jnp.dot(h, wout_ref[...],
                     preferred_element_type=jnp.float32) + bout_ref[...]   # (tb, 128)
    mx = jnp.max(logits, axis=-1, keepdims=True)
    e = jnp.exp(logits - mx)                                  # pad lanes -> exactly 0
    out_ref[...] = e / jnp.sum(e, axis=-1, keepdims=True)     # lane-dense store


# ----------------------------------------------------------------------------
# Parameters (kaiming-normal conv/linear with zero bias, PyTorch eval-mode
# BatchNorm defaults, PReLU alpha=0.25), with BN folded into the matmul
# weights/biases and layouts pre-arranged for the kernel.
# ----------------------------------------------------------------------------
def init_params(key, num_classes=NUM_CLASSES):
    assert num_classes <= _LANES_OUT
    k1, k2, k3, k4 = jax.random.split(key, 4)

    def kaiming(k, shape, fan_in):
        return jax.random.normal(k, shape, jnp.float32) * math.sqrt(2.0 / fan_in)

    w1 = kaiming(k1, (32, CHANNELS, 2, 2), CHANNELS * 4)       # Conv2d(4, 32, (2,2))
    w2 = kaiming(k2, (64, 32, 2, 2), 32 * 4)                   # Conv2d(32, 64, (2,2))
    wfc = kaiming(k3, (64, 64), 64)                            # Linear(64, 64)
    wout = kaiming(k4, (num_classes, 64), 64)                  # Linear(64, num_classes)
    b1 = jnp.zeros((32,), jnp.float32)
    b2 = jnp.zeros((64,), jnp.float32)
    bfc = jnp.zeros((64,), jnp.float32)
    bout = jnp.zeros((num_classes,), jnp.float32)

    def bn_fold(bias, c):
        # eval-mode defaults: running_mean=0, running_var=1, gamma=1, beta=0
        gamma = jnp.ones((c,), jnp.float32)
        beta = jnp.zeros((c,), jnp.float32)
        mean = jnp.zeros((c,), jnp.float32)
        var = jnp.ones((c,), jnp.float32)
        s = gamma / jnp.sqrt(var + BN_EPS)
        return s, (bias - mean) * s + beta

    s1, b1f = bn_fold(b1, 32)
    s2, b2f = bn_fold(b2, 64)
    s3, bfcf = bn_fold(bfc, 64)

    # conv1 as (16, 32) matmul weight, rows ordered (ci, ki, kj); BN1 folded.
    w1m = (w1.reshape(32, 16).T * s1[None, :]).astype(jnp.bfloat16)
    # conv2 as 4 per-tap (32, 64) weights, leading index = ki*2+kj; BN2 folded.
    w2t = jnp.transpose(w2, (2, 3, 1, 0)).reshape(4, 32, 64) * s2[None, None, :]
    # fc1 with BN3 folded.
    wfcm = wfc.T * s3[None, :]
    # output Linear padded to 128 lanes: zero weights, -1e30 bias on pad lanes
    # so softmax over 128 lanes equals softmax over the real classes.
    woutp = jnp.zeros((64, _LANES_OUT), jnp.float32).at[:, :num_classes].set(wout.T)
    boutp = jnp.full((_LANES_OUT,), -1e30, jnp.float32).at[:num_classes].set(bout)

    return dict(
        w1=w1m,
        b1=b1f.reshape(1, 32),
        alpha1=jnp.full((1, 32), 0.25, jnp.float32),
        w2=w2t.astype(jnp.float32),
        b2=b2f.reshape(1, 64),
        alpha2=jnp.full((1, 64), 0.25, jnp.float32),
        wfc=wfcm.astype(jnp.float32),
        bfc=bfcf.reshape(1, 64),
        alpha3=jnp.full((1, 64), 0.25, jnp.float32),
        wout=woutp,
        bout=boutp.reshape(1, _LANES_OUT),
        num_classes=num_classes,
    )


# ----------------------------------------------------------------------------
# Forward pass: XLA glue (padding + im2col + tile layout) + one pallas_call
# ----------------------------------------------------------------------------
def _round_up(a, b):
    return -(-a // b) * b


def feature_emg_convnet_forward(x, params):
    nc = params["num_classes"]
    x = x.reshape(-1, CHANNELS, W_IN, H_IN).astype(jnp.float32)      # (N, 4, 3, 8)
    n = x.shape[0]

    # constant pad on second-to-last dim, circular pad on last dim
    xp = jnp.pad(x, ((0, 0), (0, 0), (1, 1), (0, 0)))                # (N, 4, 5, 8)
    xp = jnp.concatenate([xp[..., -1:], xp, xp[..., :1]], axis=-1)   # (N, 4, 5, 10)

    # conv1 im2col patches for the positions pool2 actually consumes:
    # conv1 rows i in 0..2, pooled cols jp in 0..2, both pool parities.
    # feature ordering = (ci, ki, kj), matching params["w1"].
    taps = jnp.stack([xp[:, :, ki:ki + 3, kj:kj + 6]
                      for ki in (0, 1) for kj in (0, 1)], axis=2)    # (N,4,4,3,6)
    feats = taps.reshape(n, 16, 3, 3, 2)                 # (N, feat, i, jp, parity)
    p1 = feats.transpose(0, 4, 2, 3, 1).reshape(n, 2, 9, 16)  # (N, parity, pos, feat)

    tb = min(_MAX_TILE, _round_up(n, 8))                 # samples per grid step
    n_pad = _round_up(n, tb)
    g = n_pad // tb
    if n_pad != n:
        p1 = jnp.pad(p1, ((0, n_pad - n), (0, 0), (0, 0), (0, 0)))
    # Per grid block, rows ordered (parity, pos, sample); bf16 matmul operands.
    p1 = (p1.reshape(g, tb, 2, 9, 16)
             .transpose(0, 2, 3, 1, 4)
             .reshape(n_pad * 18, 16)
             .astype(jnp.bfloat16))

    rows = 18 * tb
    out = pl.pallas_call(
        _fused_forward_kernel,
        grid=(g,),
        in_specs=[
            pl.BlockSpec((rows, 16), lambda b: (b, 0)),          # conv1 patches
            pl.BlockSpec((16, 32), lambda b: (0, 0)),            # w1 (bf16)
            pl.BlockSpec((1, 32), lambda b: (0, 0)),             # b1 (BN1 folded)
            pl.BlockSpec((1, 32), lambda b: (0, 0)),             # alpha1
            pl.BlockSpec((4, 32, 64), lambda b: (0, 0, 0)),      # w2 taps
            pl.BlockSpec((1, 64), lambda b: (0, 0)),             # b2
            pl.BlockSpec((1, 64), lambda b: (0, 0)),             # alpha2
            pl.BlockSpec((64, 64), lambda b: (0, 0)),            # wfc1
            pl.BlockSpec((1, 64), lambda b: (0, 0)),             # bfc1
            pl.BlockSpec((1, 64), lambda b: (0, 0)),             # alpha3
            pl.BlockSpec((64, _LANES_OUT), lambda b: (0, 0)),    # wout (padded)
            pl.BlockSpec((1, _LANES_OUT), lambda b: (0, 0)),     # bout (padded)
        ],
        out_specs=pl.BlockSpec((tb, _LANES_OUT), lambda b: (b, 0)),
        out_shape=jax.ShapeDtypeStruct((n_pad, _LANES_OUT), jnp.float32),
        compiler_params=pltpu.CompilerParams(
            dimension_semantics=("parallel",),
            vmem_limit_bytes=32 * 1024 * 1024),
    )(p1, params["w1"], params["b1"], params["alpha1"],
      params["w2"], params["b2"], params["alpha2"],
      params["wfc"], params["bfc"], params["alpha3"],
      params["wout"], params["bout"])

    return out[:n, :nc]


if __name__ == "__main__":
    key = jax.random.PRNGKey(0)
    pkey, xkey = jax.random.split(key)
    params = init_params(pkey, num_classes=NUM_CLASSES)

    # batch of 2 feature vectors; each reshapes to (4, 3, 8) as in the module
    x = jax.random.normal(xkey, (2, CHANNELS * W_IN * H_IN), jnp.float32)

    fwd = jax.jit(lambda xx: feature_emg_convnet_forward(xx, params))
    out = jax.block_until_ready(fwd(x))

    assert out.shape == (2, NUM_CLASSES), out.shape
    assert bool(jnp.all(jnp.isfinite(out)))
    assert bool(jnp.allclose(jnp.sum(out, axis=1), 1.0, atol=1e-4))
    print("KERNEL_OK")
</pallas_src>

<mosaic_0001>
module attributes {stable_mosaic.version = 11 : i64} {
  func.func @_fused_forward_kernel(%arg0: i32, %arg1: memref<144x16xbf16, #tpu.memory_space<vmem>>, %arg2: memref<16x32xbf16, #tpu.memory_space<vmem>>, %arg3: memref<1x32xf32, #tpu.memory_space<vmem>>, %arg4: memref<1x32xf32, #tpu.memory_space<vmem>>, %arg5: memref<4x32x64xf32, #tpu.memory_space<vmem>>, %arg6: memref<1x64xf32, #tpu.memory_space<vmem>>, %arg7: memref<1x64xf32, #tpu.memory_space<vmem>>, %arg8: memref<64x64xf32, #tpu.memory_space<vmem>>, %arg9: memref<1x64xf32, #tpu.memory_space<vmem>>, %arg10: memref<1x64xf32, #tpu.memory_space<vmem>>, %arg11: memref<64x128xf32, #tpu.memory_space<vmem>>, %arg12: memref<1x128xf32, #tpu.memory_space<vmem>>, %arg13: memref<8x128xf32, #tpu.memory_space<vmem>>) attributes {dimension_semantics = [#tpu.dimension_semantics<parallel>], iteration_bounds = array<i64: 1>, scalar_prefetch = 0 : i64, scratch_operands = 0 : i64, tpu.core_type = #tpu.core_type<tc>, window_params = [{transform_indices = @transform_0, window_bounds = array<i64: 144, 16>}, {pipeline_mode = #tpu.pipeline_mode<synchronous>, transform_indices = @transform_1, window_bounds = array<i64: 16, 32>}, {pipeline_mode = #tpu.pipeline_mode<synchronous>, transform_indices = @transform_2, window_bounds = array<i64: 1, 32>}, {pipeline_mode = #tpu.pipeline_mode<synchronous>, transform_indices = @transform_3, window_bounds = array<i64: 1, 32>}, {pipeline_mode = #tpu.pipeline_mode<synchronous>, transform_indices = @transform_4, window_bounds = array<i64: 4, 32, 64>}, {pipeline_mode = #tpu.pipeline_mode<synchronous>, transform_indices = @transform_5, window_bounds = array<i64: 1, 64>}, {pipeline_mode = #tpu.pipeline_mode<synchronous>, transform_indices = @transform_6, window_bounds = array<i64: 1, 64>}, {pipeline_mode = #tpu.pipeline_mode<synchronous>, transform_indices = @transform_7, window_bounds = array<i64: 64, 64>}, {pipeline_mode = #tpu.pipeline_mode<synchronous>, transform_indices = @transform_8, window_bounds = array<i64: 1, 64>}, {pipeline_mode = #tpu.pipeline_mode<synchronous>, transform_indices = @transform_9, window_bounds = array<i64: 1, 64>}, {pipeline_mode = #tpu.pipeline_mode<synchronous>, transform_indices = @transform_10, window_bounds = array<i64: 64, 128>}, {pipeline_mode = #tpu.pipeline_mode<synchronous>, transform_indices = @transform_11, window_bounds = array<i64: 1, 128>}, {transform_indices = @transform_12, window_bounds = array<i64: 8, 128>}]} {
    %c0 = arith.constant 0 : index
    %c0_0 = arith.constant 0 : index
    %0 = vector.load %arg1[%c0, %c0_0] : memref<144x16xbf16, #tpu.memory_space<vmem>>, vector<144x16xbf16>
    %c0_1 = arith.constant 0 : index
    %c0_2 = arith.constant 0 : index
    %1 = vector.load %arg2[%c0_1, %c0_2] : memref<16x32xbf16, #tpu.memory_space<vmem>>, vector<16x32xbf16>
    %cst = arith.constant dense<0.000000e+00> : vector<144x32xf32>
    %2 = tpu.matmul %0, %1, %cst {dimension_numbers = #tpu.dot_dimension_numbers<[1], [0], [0], [1], [0, 0, 1, 1], [], []>} : vector<144x16xbf16>, vector<16x32xbf16>, vector<144x32xf32> -> vector<144x32xf32>
    %3 = vector.extract_strided_slice %2 {offsets = [0, 0], sizes = [72, 32], strides = [1, 1]} : vector<144x32xf32> to vector<72x32xf32>
    %4 = vector.extract_strided_slice %2 {offsets = [72, 0], sizes = [72, 32], strides = [1, 1]} : vector<144x32xf32> to vector<72x32xf32>
    %5 = arith.maximumf %3, %4 : vector<72x32xf32>
    %c0_3 = arith.constant 0 : index
    %c0_4 = arith.constant 0 : index
    %6 = vector.load %arg3[%c0_3, %c0_4] : memref<1x32xf32, #tpu.memory_space<vmem>>, vector<1x32xf32>
    %7 = vector.broadcast %6 : vector<1x32xf32> to vector<72x32xf32>
    %8 = arith.addf %5, %7 : vector<72x32xf32>
    %cst_5 = arith.constant 0.000000e+00 : f32
    %9 = vector.broadcast %cst_5 : f32 to vector<72x32xf32>
    %10 = arith.cmpf oge, %8, %9 : vector<72x32xf32>
    %c0_6 = arith.constant 0 : index
    %c0_7 = arith.constant 0 : index
    %11 = vector.load %arg4[%c0_6, %c0_7] : memref<1x32xf32, #tpu.memory_space<vmem>>, vector<1x32xf32>
    %12 = vector.broadcast %11 : vector<1x32xf32> to vector<72x32xf32>
    %13 = arith.mulf %12, %8 : vector<72x32xf32>
    %14 = arith.select %10, %8, %13 : vector<72x32xi1>, vector<72x32xf32>
    %15 = vector.extract_strided_slice %14 {offsets = [0, 0], sizes = [8, 32], strides = [1, 1]} : vector<72x32xf32> to vector<8x32xf32>
    %16 = vector.extract_strided_slice %14 {offsets = [8, 0], sizes = [8, 32], strides = [1, 1]} : vector<72x32xf32> to vector<8x32xf32>
    %17 = vector.extract_strided_slice %14 {offsets = [24, 0], sizes = [8, 32], strides = [1, 1]} : vector<72x32xf32> to vector<8x32xf32>
    %18 = vector.extract_strided_slice %14 {offsets = [32, 0], sizes = [8, 32], strides = [1, 1]} : vector<72x32xf32> to vector<8x32xf32>
    %19 = tpu.concatenate %15, %16, %17, %18 in 0 : vector<8x32xf32>, vector<8x32xf32>, vector<8x32xf32>, vector<8x32xf32> -> vector<32x32xf32>
    %c0_8 = arith.constant 0 : index
    %c0_9 = arith.constant 0 : index
    %c0_10 = arith.constant 0 : index
    %20 = vector.load %arg5[%c0_8, %c0_9, %c0_10] : memref<4x32x64xf32, #tpu.memory_space<vmem>>, vector<1x32x64xf32>
    %21 = vector.shape_cast %20 : vector<1x32x64xf32> to vector<32x64xf32>
    %cst_11 = arith.constant dense<0.000000e+00> : vector<32x64xf32>
    %22 = tpu.matmul %19, %21, %cst_11 {dimension_numbers = #tpu.dot_dimension_numbers<[1], [0], [0], [1], [0, 0, 1, 1], [], []>} : vector<32x32xf32>, vector<32x64xf32>, vector<32x64xf32> -> vector<32x64xf32>
    %23 = vector.extract_strided_slice %14 {offsets = [8, 0], sizes = [8, 32], strides = [1, 1]} : vector<72x32xf32> to vector<8x32xf32>
    %24 = vector.extract_strided_slice %14 {offsets = [16, 0], sizes = [8, 32], strides = [1, 1]} : vector<72x32xf32> to vector<8x32xf32>
    %25 = vector.extract_strided_slice %14 {offsets = [32, 0], sizes = [8, 32], strides = [1, 1]} : vector<72x32xf32> to vector<8x32xf32>
    %26 = vector.extract_strided_slice %14 {offsets = [40, 0], sizes = [8, 32], strides = [1, 1]} : vector<72x32xf32> to vector<8x32xf32>
    %27 = tpu.concatenate %23, %24, %25, %26 in 0 : vector<8x32xf32>, vector<8x32xf32>, vector<8x32xf32>, vector<8x32xf32> -> vector<32x32xf32>
    %c1 = arith.constant 1 : index
    %c0_12 = arith.constant 0 : index
    %c0_13 = arith.constant 0 : index
    %28 = vector.load %arg5[%c1, %c0_12, %c0_13] : memref<4x32x64xf32, #tpu.memory_space<vmem>>, vector<1x32x64xf32>
    %29 = vector.shape_cast %28 : vector<1x32x64xf32> to vector<32x64xf32>
    %cst_14 = arith.constant dense<0.000000e+00> : vector<32x64xf32>
    %30 = tpu.matmul %27, %29, %cst_14 {dimension_numbers = #tpu.dot_dimension_numbers<[1], [0], [0], [1], [0, 0, 1, 1], [], []>} : vector<32x32xf32>, vector<32x64xf32>, vector<32x64xf32> -> vector<32x64xf32>
    %31 = vector.extract_strided_slice %14 {offsets = [24, 0], sizes = [8, 32], strides = [1, 1]} : vector<72x32xf32> to vector<8x32xf32>
    %32 = vector.extract_strided_slice %14 {offsets = [32, 0], sizes = [8, 32], strides = [1, 1]} : vector<72x32xf32> to vector<8x32xf32>
    %33 = vector.extract_strided_slice %14 {offsets = [48, 0], sizes = [8, 32], strides = [1, 1]} : vector<72x32xf32> to vector<8x32xf32>
    %34 = vector.extract_strided_slice %14 {offsets = [56, 0], sizes = [8, 32], strides = [1, 1]} : vector<72x32xf32> to vector<8x32xf32>
    %35 = tpu.concatenate %31, %32, %33, %34 in 0 : vector<8x32xf32>, vector<8x32xf32>, vector<8x32xf32>, vector<8x32xf32> -> vector<32x32xf32>
    %c2 = arith.constant 2 : index
    %c0_15 = arith.constant 0 : index
    %c0_16 = arith.constant 0 : index
    %36 = vector.load %arg5[%c2, %c0_15, %c0_16] : memref<4x32x64xf32, #tpu.memory_space<vmem>>, vector<1x32x64xf32>
    %37 = vector.shape_cast %36 : vector<1x32x64xf32> to vector<32x64xf32>
    %cst_17 = arith.constant dense<0.000000e+00> : vector<32x64xf32>
    %38 = tpu.matmul %35, %37, %cst_17 {dimension_numbers = #tpu.dot_dimension_numbers<[1], [0], [0], [1], [0, 0, 1, 1], [], []>} : vector<32x32xf32>, vector<32x64xf32>, vector<32x64xf32> -> vector<32x64xf32>
    %39 = vector.extract_strided_slice %14 {offsets = [32, 0], sizes = [8, 32], strides = [1, 1]} : vector<72x32xf32> to vector<8x32xf32>
    %40 = vector.extract_strided_slice %14 {offsets = [40, 0], sizes = [8, 32], strides = [1, 1]} : vector<72x32xf32> to vector<8x32xf32>
    %41 = vector.extract_strided_slice %14 {offsets = [56, 0], sizes = [8, 32], strides = [1, 1]} : vector<72x32xf32> to vector<8x32xf32>
    %42 = vector.extract_strided_slice %14 {offsets = [64, 0], sizes = [8, 32], strides = [1, 1]} : vector<72x32xf32> to vector<8x32xf32>
    %43 = tpu.concatenate %39, %40, %41, %42 in 0 : vector<8x32xf32>, vector<8x32xf32>, vector<8x32xf32>, vector<8x32xf32> -> vector<32x32xf32>
    %c3 = arith.constant 3 : index
    %c0_18 = arith.constant 0 : index
    %c0_19 = arith.constant 0 : index
    %44 = vector.load %arg5[%c3, %c0_18, %c0_19] : memref<4x32x64xf32, #tpu.memory_space<vmem>>, vector<1x32x64xf32>
    %45 = vector.shape_cast %44 : vector<1x32x64xf32> to vector<32x64xf32>
    %cst_20 = arith.constant dense<0.000000e+00> : vector<32x64xf32>
    %46 = tpu.matmul %43, %45, %cst_20 {dimension_numbers = #tpu.dot_dimension_numbers<[1], [0], [0], [1], [0, 0, 1, 1], [], []>} : vector<32x32xf32>, vector<32x64xf32>, vector<32x64xf32> -> vector<32x64xf32>
    %47 = arith.addf %22, %30 : vector<32x64xf32>
    %48 = arith.addf %47, %38 : vector<32x64xf32>
    %49 = arith.addf %48, %46 : vector<32x64xf32>
    %50 = vector.extract_strided_slice %49 {offsets = [0, 0], sizes = [8, 64], strides = [1, 1]} : vector<32x64xf32> to vector<8x64xf32>
    %51 = vector.extract_strided_slice %49 {offsets = [8, 0], sizes = [8, 64], strides = [1, 1]} : vector<32x64xf32> to vector<8x64xf32>
    %52 = arith.maximumf %50, %51 : vector<8x64xf32>
    %53 = vector.extract_strided_slice %49 {offsets = [16, 0], sizes = [8, 64], strides = [1, 1]} : vector<32x64xf32> to vector<8x64xf32>
    %54 = vector.extract_strided_slice %49 {offsets = [24, 0], sizes = [8, 64], strides = [1, 1]} : vector<32x64xf32> to vector<8x64xf32>
    %55 = arith.maximumf %53, %54 : vector<8x64xf32>
    %56 = arith.maximumf %52, %55 : vector<8x64xf32>
    %c0_21 = arith.constant 0 : index
    %c0_22 = arith.constant 0 : index
    %57 = vector.load %arg6[%c0_21, %c0_22] : memref<1x64xf32, #tpu.memory_space<vmem>>, vector<1x64xf32>
    %58 = vector.broadcast %57 : vector<1x64xf32> to vector<8x64xf32>
    %59 = arith.addf %56, %58 : vector<8x64xf32>
    %cst_23 = arith.constant 0.000000e+00 : f32
    %60 = vector.broadcast %cst_23 : f32 to vector<8x64xf32>
    %61 = arith.cmpf oge, %59, %60 : vector<8x64xf32>
    %c0_24 = arith.constant 0 : index
    %c0_25 = arith.constant 0 : index
    %62 = vector.load %arg7[%c0_24, %c0_25] : memref<1x64xf32, #tpu.memory_space<vmem>>, vector<1x64xf32>
    %63 = vector.broadcast %62 : vector<1x64xf32> to vector<8x64xf32>
    %64 = arith.mulf %63, %59 : vector<8x64xf32>
    %65 = arith.select %61, %59, %64 : vector<8x64xi1>, vector<8x64xf32>
    %c0_26 = arith.constant 0 : index
    %c0_27 = arith.constant 0 : index
    %66 = vector.load %arg8[%c0_26, %c0_27] : memref<64x64xf32, #tpu.memory_space<vmem>>, vector<64x64xf32>
    %cst_28 = arith.constant dense<0.000000e+00> : vector<8x64xf32>
    %67 = tpu.matmul %65, %66, %cst_28 {dimension_numbers = #tpu.dot_dimension_numbers<[1], [0], [0], [1], [0, 0, 1, 1], [], []>} : vector<8x64xf32>, vector<64x64xf32>, vector<8x64xf32> -> vector<8x64xf32>
    %c0_29 = arith.constant 0 : index
    %c0_30 = arith.constant 0 : index
    %68 = vector.load %arg9[%c0_29, %c0_30] : memref<1x64xf32, #tpu.memory_space<vmem>>, vector<1x64xf32>
    %69 = vector.broadcast %68 : vector<1x64xf32> to vector<8x64xf32>
    %70 = arith.addf %67, %69 : vector<8x64xf32>
    %cst_31 = arith.constant 0.000000e+00 : f32
    %71 = vector.broadcast %cst_31 : f32 to vector<8x64xf32>
    %72 = arith.cmpf oge, %70, %71 : vector<8x64xf32>
    %c0_32 = arith.constant 0 : index
    %c0_33 = arith.constant 0 : index
    %73 = vector.load %arg10[%c0_32, %c0_33] : memref<1x64xf32, #tpu.memory_space<vmem>>, vector<1x64xf32>
    %74 = vector.broadcast %73 : vector<1x64xf32> to vector<8x64xf32>
    %75 = arith.mulf %74, %70 : vector<8x64xf32>
    %76 = arith.select %72, %70, %75 : vector<8x64xi1>, vector<8x64xf32>
    %c0_34 = arith.constant 0 : index
    %c0_35 = arith.constant 0 : index
    %77 = vector.load %arg11[%c0_34, %c0_35] : memref<64x128xf32, #tpu.memory_space<vmem>>, vector<64x128xf32>
    %cst_36 = arith.constant dense<0.000000e+00> : vector<8x128xf32>
    %78 = tpu.matmul %76, %77, %cst_36 {dimension_numbers = #tpu.dot_dimension_numbers<[1], [0], [0], [1], [0, 0, 1, 1], [], []>} : vector<8x64xf32>, vector<64x128xf32>, vector<8x128xf32> -> vector<8x128xf32>
    %c0_37 = arith.constant 0 : index
    %c0_38 = arith.constant 0 : index
    %79 = vector.load %arg12[%c0_37, %c0_38] : memref<1x128xf32, #tpu.memory_space<vmem>>, vector<1x128xf32>
    %80 = vector.broadcast %79 : vector<1x128xf32> to vector<8x128xf32>
    %81 = arith.addf %78, %80 : vector<8x128xf32>
    %cst_39 = arith.constant dense<0xFF800000> : vector<8xf32>
    %82 = vector.multi_reduction <maximumf>, %81, %cst_39 [1] : vector<8x128xf32> to vector<8xf32>
    %83 = vector.shape_cast %82 : vector<8xf32> to vector<8x1xf32>
    %84 = vector.broadcast %83 : vector<8x1xf32> to vector<8x128xf32>
    %85 = arith.subf %81, %84 : vector<8x128xf32>
    %86 = math.exp %85 : vector<8x128xf32>
    %cst_40 = arith.constant dense<0.000000e+00> : vector<8xf32>
    %87 = vector.multi_reduction <add>, %86, %cst_40 [1] : vector<8x128xf32> to vector<8xf32>
    %88 = vector.shape_cast %87 : vector<8xf32> to vector<8x1xf32>
    %89 = vector.broadcast %88 : vector<8x1xf32> to vector<8x128xf32>
    %90 = arith.divf %86, %89 : vector<8x128xf32>
    %c0_41 = arith.constant 0 : index
    %c0_42 = arith.constant 0 : index
    %91 = vector.load %arg13[%c0_41, %c0_42] : memref<8x128xf32, #tpu.memory_space<vmem>>, vector<8x128xf32>
    tpu.vector_store %arg13[%c0_41, %c0_42], %90 {strides = array<i32>} : memref<8x128xf32, #tpu.memory_space<vmem>>, vector<8x128xf32>,
    return
  }
  func.func @transform_0(%arg0: i32) -> (i32, i32) {
    %c0_i32 = arith.constant 0 : i32
    %c0_i32_0 = arith.constant 0 : i32
    return %arg0, %c0_i32 : i32, i32
  }
  func.func @transform_1(%arg0: i32) -> (i32, i32) {
    %c0_i32 = arith.constant 0 : i32
    %c0_i32_0 = arith.constant 0 : i32
    %c0_i32_1 = arith.constant 0 : i32
    return %c0_i32, %c0_i32_0 : i32, i32
  }
  func.func @transform_2(%arg0: i32) -> (i32, i32) {
    %c0_i32 = arith.constant 0 : i32
    %c0_i32_0 = arith.constant 0 : i32
    %c0_i32_1 = arith.constant 0 : i32
    return %c0_i32, %c0_i32_0 : i32, i32
  }
  func.func @transform_3(%arg0: i32) -> (i32, i32) {
    %c0_i32 = arith.constant 0 : i32
    %c0_i32_0 = arith.constant 0 : i32
    %c0_i32_1 = arith.constant 0 : i32
    return %c0_i32, %c0_i32_0 : i32, i32
  }
  func.func @transform_4(%arg0: i32) -> (i32, i32, i32) {
    %c0_i32 = arith.constant 0 : i32
    %c0_i32_0 = arith.constant 0 : i32
    %c0_i32_1 = arith.constant 0 : i32
    %c0_i32_2 = arith.constant 0 : i32
    return %c0_i32, %c0_i32_0, %c0_i32_1 : i32, i32, i32
  }
  func.func @transform_5(%arg0: i32) -> (i32, i32) {
    %c0_i32 = arith.constant 0 : i32
    %c0_i32_0 = arith.constant 0 : i32
    %c0_i32_1 = arith.constant 0 : i32
    return %c0_i32, %c0_i32_0 : i32, i32
  }
  func.func @transform_6(%arg0: i32) -> (i32, i32) {
    %c0_i32 = arith.constant 0 : i32
    %c0_i32_0 = arith.constant 0 : i32
    %c0_i32_1 = arith.constant 0 : i32
    return %c0_i32, %c0_i32_0 : i32, i32
  }
  func.func @transform_7(%arg0: i32) -> (i32, i32) {
    %c0_i32 = arith.constant 0 : i32
    %c0_i32_0 = arith.constant 0 : i32
    %c0_i32_1 = arith.constant 0 : i32
    return %c0_i32, %c0_i32_0 : i32, i32
  }
  func.func @transform_8(%arg0: i32) -> (i32, i32) {
    %c0_i32 = arith.constant 0 : i32
    %c0_i32_0 = arith.constant 0 : i32
    %c0_i32_1 = arith.constant 0 : i32
    return %c0_i32, %c0_i32_0 : i32, i32
  }
  func.func @transform_9(%arg0: i32) -> (i32, i32) {
    %c0_i32 = arith.constant 0 : i32
    %c0_i32_0 = arith.constant 0 : i32
    %c0_i32_1 = arith.constant 0 : i32
    return %c0_i32, %c0_i32_0 : i32, i32
  }
  func.func @transform_10(%arg0: i32) -> (i32, i32) {
    %c0_i32 = arith.constant 0 : i32
    %c0_i32_0 = arith.constant 0 : i32
    %c0_i32_1 = arith.constant 0 : i32
    return %c0_i32, %c0_i32_0 : i32, i32
  }
  func.func @transform_11(%arg0: i32) -> (i32, i32) {
    %c0_i32 = arith.constant 0 : i32
    %c0_i32_0 = arith.constant 0 : i32
    %c0_i32_1 = arith.constant 0 : i32
    return %c0_i32, %c0_i32_0 : i32, i32
  }
  func.func @transform_12(%arg0: i32) -> (i32, i32) {
    %c0_i32 = arith.constant 0 : i32
    %c0_i32_0 = arith.constant 0 : i32
    return %arg0, %c0_i32 : i32, i32
  }
}

</mosaic_0001>

<bundles_post_ra>
// kernel: _lambda_.1
= control target key start
LH: loop header
LB: loop body
LE: loop exit
PB: predicated region body
PF: predicated region fallthrough
CT: control target
= control target key end

     0   :  { %v1255_v0 = vmov 0.0   ;;  %vm1256_vm0 = vmmov 0   ;;  %vm113_vm1 = vcmask 130048   ;;  %vm314_vm3 = vcmask 261120   ;;  %s1570_s1 = inlined_call_operand.vmem [shape: bf16[16,32], index: 1, kind: input, shape index: {}]   ;;  %s1571_s0 = inlined_call_operand.vmem [shape: bf16[144,16], index: 0, kind: input, shape index: {}]   ;;  %s1572_s4 = inlined_call_operand.vmem [shape: f32[4,32,64], index: 4, kind: input, shape index: {}]   ;;  %s1573_s2 = inlined_call_operand.vmem [shape: f32[1,32], index: 2, kind: input, shape index: {}]   ;;  %s1574_s3 = inlined_call_operand.vmem [shape: f32[1,32], index: 3, kind: input, shape index: {}]   ;;  %s1575_s7 = inlined_call_operand.vmem [shape: f32[64,64], index: 7, kind: input, shape index: {}]   ;;  %s1576_s5 = inlined_call_operand.vmem [shape: f32[1,64], index: 5, kind: input, shape index: {}, may-alias: {5,8}]   ;;  %s1577_s6 = inlined_call_operand.vmem [shape: f32[1,64], index: 6, kind: input, shape index: {}, may-alias: {6,9}]   ;;  %s1578_s10 = inlined_call_operand.vmem [shape: f32[64,128], index: 10, kind: input, shape index: {}]   ;;  %s1579_s8 = inlined_call_operand.vmem [shape: f32[1,64], index: 8, kind: input, shape index: {}, may-alias: {5,8}]   ;;  %s1580_s9 = inlined_call_operand.vmem [shape: f32[1,64], index: 9, kind: input, shape index: {}, may-alias: {6,9}]   ;;  %s1581_s11 = inlined_call_operand.vmem [shape: f32[1,128], index: 11, kind: input, shape index: {}]   ;;  %s1582_s12 = inlined_call_operand.vmem [shape: f32[8,128], index: 12, kind: output, shape index: {}]  }
   0x1   :  { %1038 = vmatprep.subr.bf16.mxu0 %v1255_v0  ;;  %v1241_v1 = vld [vmem:[%s1570_s1] sm:$0xff]   ;;  %1040 = vmatprep.mubr.msk.bf16.mxu0 %vm1256_vm0, %v1255_v0  ;;  %v1243_v3 = vld [vmem:[%s1571_s0 + $0x8] sm:$0xff]   ;;  %v1244_v4 = vld [vmem:[%s1571_s0 + $0x10] sm:$0xff]   ;;  %vm736_vm13 = vcmask 523264  }
   0x2   :  { %v1242_v2 = vld [vmem:[%s1571_s0] sm:$0xff]   ;;  %1039 = vmatpush3.bf16.msra.mxu0 %v1241_v1  ;;  %v1245_v5 = vld [vmem:[%s1571_s0 + $0x18] sm:$0xff]   ;;  %v1247_v7 = vld [vmem:[%s1571_s0 + $0x28] sm:$0xff]  }
   0x3   :  { %v1246_v6 = vld [vmem:[%s1571_s0 + $0x20] sm:$0xff]   ;;  %v1248_v8 = vld [vmem:[%s1571_s0 + $0x30] sm:$0xff]   ;;  %v1249_v9 = vld [vmem:[%s1571_s0 + $0x38] sm:$0xff]  }
   0x4   :  { %v1250_v10 = vld [vmem:[%s1571_s0 + $0x40] sm:$0xff]   ;;  %v944_v12 = vld [vmem:[%s1572_s4 + $0x28] sm:$0xff]  ;;  %v945_v14 = vld [vmem:[%s1572_s4 + $0x30] sm:$0xff] }
   0x5   :  { %1041 = vmatmul.mubr.msk.bf16.vlgmr.msra.gmra.mrb[0].mxu0 %vm113_vm1, %v1242_v2  ;;  %v943_v11 = vld [vmem:[%s1572_s4 + $0x20] sm:$0xff]  ;;  %v946_v15 = vld [vmem:[%s1572_s4 + $0x38] sm:$0xff]  ;;  %v952_v18 = vld [vmem:[%s1572_s4 + $0x48] sm:$0xff] }
   0x6   :  { %1044 = vmatprep.mubr.msk.bf16.mxu0 %vm1256_vm0, %v1255_v0  ;;  %v1170_v13 = vpack.c.bf16 %v944_v12, %v943_v11  ;;  %v1174_v16 = vpack.c.bf16 %v946_v15, %v945_v14  ;;  %v951_v17 = vld [vmem:[%s1572_s4 + $0x40] sm:$0xff]  ;;  %v953_v52 = vld [vmem:[%s1572_s4 + $0x50] sm:$0xff]  ;;  %v954_v53 = vld [vmem:[%s1572_s4 + $0x58] sm:$0xff] }
   0x7   :  { %v1178_v19 = vpack.c.bf16 %v952_v18, %v951_v17  ;;  %v1412_v44 = vld [vmem:[%s1573_s2] ss:$0 sm:$0xff]  ;;  %v1182_v57 = vpack.c.bf16 %v954_v53, %v953_v52  ;;  %v960_v62 = vld [vmem:[%s1572_s4 + $0x68] sm:$0xff] }
   0x8   :  { %1171 = vmatprep.subr.bf16.mxu1 %v1170_v13  ;;  %v1418_v49 = vld [vmem:[%s1574_s3] ss:$0 sm:$0xff] }
   0x9   :  { %1173 = vmatpush3.bf16.msra.mxu1 %v1170_v13  ;;  %v959_v61 = vld [vmem:[%s1572_s4 + $0x60] sm:$0xff] }
   0xa   :  { %1175 = vmatprep.subr.bf16.mxu1 %v1174_v16  ;;  %v725_v53 = vld [vmem:[%s1575_s7 + $0x20] sm:$0xff] }
   0xd   :  { %1045 = vmatmul.mubr.msk.bf16.gmra.mrb[4].mxu0 %vm113_vm1, %v1243_v3  ;;  %1177 = vmatpush3.bf16.msra.mxu1 %v1174_v16  ;;  %v1186_v3 = vpack.c.bf16 %v960_v62, %v959_v61 }
   0xe   :  { %1048 = vmatprep.mubr.msk.bf16.mxu0 %vm1256_vm0, %v1255_v0  ;;  %1179 = vmatprep.subr.bf16.mxu1 %v1178_v19 }
  0x15   :  { %1049 = vmatmul.mubr.msk.bf16.gmra.mrb[8].mxu0 %vm113_vm1, %v1244_v4 }
  0x16   :  { %1052 = vmatprep.mubr.msk.bf16.mxu0 %vm1256_vm0, %v1255_v0 }
  0x1d   :  { %1053 = vmatmul.mubr.msk.bf16.gmra.mrb[12].mxu0 %vm113_vm1, %v1245_v5 }
  0x1e   :  { %1056 = vmatprep.mubr.msk.bf16.mxu0 %vm1256_vm0, %v1255_v0 }
  0x25   :  { %1057 = vmatmul.mubr.msk.bf16.gmra.mrb[16].mxu0 %vm113_vm1, %v1246_v6 }
  0x26   :  { %1060 = vmatprep.mubr.msk.bf16.mxu0 %vm1256_vm0, %v1255_v0 }
  0x2d   :  { %1061 = vmatmul.mubr.msk.bf16.gmra.mrb[20].mxu0 %vm113_vm1, %v1247_v7 }
  0x2e   :  { %1064 = vmatprep.mubr.msk.bf16.mxu0 %vm1256_vm0, %v1255_v0 }
  0x35   :  { %1065 = vmatmul.mubr.msk.bf16.gmra.mrb[24].mxu0 %vm113_vm1, %v1248_v8 }
  0x36   :  { %1068 = vmatprep.mubr.msk.bf16.mxu0 %vm1256_vm0, %v1255_v0 }
  0x3d   :  { %1069 = vmatmul.mubr.msk.bf16.gmra.mrb[28].mxu0 %vm113_vm1, %v1249_v9 }
  0x3e   :  { %1072 = vmatprep.mubr.msk.bf16.mxu0 %vm1256_vm0, %v1255_v0 }
  0x45   :  { %1073 = vmatmul.mubr.msk.bf16.gmra.mrb[32].mxu0 %vm113_vm1, %v1250_v10 }
  0xd8   :  { %v1399_v20 = vpop.f32.mrb[0].mxu0 }
  0xd9   :  { %v1042_v21 = vpop.f32.mrb[1].mxu0 }
  0xda   :  { %v178_v22 = vpop.f32.mrb[2].mxu0  ;;  %v962_v21 = vld [vmem:[%s1572_s4 + $0x78] sm:$0xff] }
  0xdb   :  { %v1043_v23 = vpop.f32.mrb[3].mxu0 }
  0xe0   :  { %v183_v24 = vpop.f32.mrb[4].mxu0 }
  0xe1   :  { %v1046_v25 = vpop.f32.mrb[5].mxu0 }
  0xe2   :  { %v186_v26 = vpop.f32.mrb[6].mxu0 }
  0xe3   :  { %v1047_v27 = vpop.f32.mrb[7].mxu0 }
  0xe8   :  { %v191_v28 = vpop.f32.mrb[8].mxu0 }
  0xe9   :  { %v1050_v29 = vpop.f32.mrb[9].mxu0 }
  0xea   :  { %v194_v30 = vpop.f32.mrb[10].mxu0 }
  0xeb   :  { %v1051_v31 = vpop.f32.mrb[11].mxu0 }
  0xf0   :  { %v199_v32 = vpop.f32.mrb[12].mxu0 }
  0xf1   :  { %v1054_v33 = vpop.f32.mrb[13].mxu0 }
  0xf2   :  { %v1401_v34 = vpop.f32.mrb[14].mxu0  ;;  %v306_v33 = vld [vmem:[%s1572_s4 + $0x8] sm:$0xff] }
  0xf3   :  { %v1055_v35 = vpop.f32.mrb[15].mxu0 }
  0xf8   :  { %v1403_v36 = vpop.f32.mrb[16].mxu0 }
  0xf9   :  { %v1058_v37 = vpop.f32.mrb[17].mxu0 }
  0xfa   :  { %v1405_v38 = vpop.f32.mrb[18].mxu0 }
  0xfb   :  { %v246_v39 = vmax.f32 %v1399_v20, %v1405_v38  ;;  %v1059_v40 = vpop.f32.mrb[19].mxu0 }
 0x100   :  { %v215_v41 = vpop.f32.mrb[20].mxu0 }
 0x101   :  { %v247_v42 = vmax.f32 %v178_v22, %v215_v41  ;;  %v1062_v43 = vpop.f32.mrb[21].mxu0  ;;  %v307_v41 = vld [vmem:[%s1572_s4 + $0x10] sm:$0xff] }
 0x102   :  { %v218_v45 = vpop.f32.mrb[22].mxu0  ;;  %v262_v43 = vadd.f32 %v1412_v44, %v246_v39  ;;  %v1257_v39 = vmov 0.0|0.0  }
 0x103   :  { %v263_v46 = vadd.f32 %v1412_v44, %v247_v42  ;;  %v248_v47 = vmax.f32 %v183_v24, %v218_v45  ;;  %v1063_v48 = vpop.f32.mrb[23].mxu0  ;;  %v308_v42 = vld [vmem:[%s1572_s4 + $0x18] sm:$0xff] }
 0x104   :  { %v1198_v45 = vpack.c.bf16 %v308_v42, %v307_v41  ;;  %vm271_vm11 = vcmp.ge.f32.partialorder %v262_v43, 0.0  ;;  %v722_v48 = vld [vmem:[%s1575_s7 + $0x8] sm:$0xff] }
 0x105   :  { %v264_v50 = vadd.f32 %v1412_v44, %v248_v47  ;;  %vm272_vm2 = vcmp.ge.f32.partialorder %v263_v46, 0.0  ;;  %v288_v51 = vmul.f32 %v1418_v49, %v263_v46  ;;  %v287_v47 = vmul.f32 %v1418_v49, %v262_v43 }
 0x107   :  { %v289_v54 = vmul.f32 %v1418_v49, %v264_v50  ;;  %v1429_v55 = vsel %vm272_vm2, %v263_v46, %v288_v51  ;;  %vm273_vm4 = vcmp.ge.f32.partialorder %v264_v50, 0.0  ;;  %v296_v38 = vsel %vm271_vm11, %v262_v43, %v287_v47  ;;  %v724_v51 = vld [vmem:[%s1575_s7 + $0x18] sm:$0xff] }
 0x108   :  { %v223_v56 = vpop.f32.mrb[24].mxu0  ;;  %1084 = vmatprep.mubr.msk.f32.mxu1 %vm314_vm3, %v1429_v55 }
 0x109   :  { %v249_v58 = vmax.f32 %v186_v26, %v223_v56  ;;  %v1066_v59 = vpop.f32.mrb[25].mxu0  ;;  %v298_v60 = vsel %vm273_vm4, %v264_v50, %v289_v54  ;;  %v723_v50 = vld [vmem:[%s1575_s7 + $0x10] sm:$0xff]  ;;  %v726_v54 = vld [vmem:[%s1575_s7 + $0x28] sm:$0xff] }
 0x10a   :  { %v226_v63 = vpop.f32.mrb[26].mxu0  ;;  %1085 = vmatmul.mubr.msk.f32.vlgmr.msra.gmra.mrb[0].mxu1 %vm314_vm3, %v298_v60  ;;  %v1206_v52 = vpack.c.bf16 %v724_v51, %v723_v50  ;;  %v727_v56 = vld [vmem:[%s1575_s7 + $0x30] sm:$0xff] }
 0x10b   :  { %v250_v1 = vmax.f32 %v191_v28, %v226_v63  ;;  %v1067_v2 = vpop.f32.mrb[27].mxu0  ;;  %1181 = vmatpush3.bf16.msra.mxu1 %v1178_v19  ;;  %v265_v6 = vadd.f32 %v1412_v44, %v249_v58  ;;  %v961_v19 = vld [vmem:[%s1572_s4 + $0x70] sm:$0xff] }
 0x10c   :  { %1183 = vmatprep.subr.bf16.mxu1 %v1182_v57  ;;  %v1190_v28 = vpack.c.bf16 %v962_v21, %v961_v19  ;;  %v971_v2 = vld [vmem:[%s1576_s5] ss:$0 sm:$0xff] }
 0x10d   :  { %v266_v4 = vadd.f32 %v1412_v44, %v250_v1  ;;  %v290_v15 = vmul.f32 %v1418_v49, %v265_v6  ;;  %vm274_vm7 = vcmp.ge.f32.partialorder %v265_v6, 0.0  ;;  %v973_v19 = vld [vmem:[%s1579_s8] ss:$0 sm:$0xff] }
 0x10f   :  { %v291_v5 = vmul.f32 %v1418_v49, %v266_v4  ;;  %vm275_vm5 = vcmp.ge.f32.partialorder %v266_v4, 0.0  ;;  %1185 = vmatpush3.bf16.msra.mxu1 %v1182_v57  ;;  %v299_v24 = vsel %vm274_vm7, %v265_v6, %v290_v15  ;;  %v728_v57 = vld [vmem:[%s1575_s7 + $0x38] sm:$0xff]  ;;  %v821_v6 = vld [vmem:[%s1578_s10 + $0x8] sm:$0xff] }
 0x110   :  { %v231_v7 = vpop.f32.mrb[28].mxu0  ;;  %1187 = vmatprep.subr.bf16.mxu1 %v1186_v3  ;;  %v1212_v58 = vpack.c.bf16 %v728_v57, %v727_v56  ;;  %v825_v15 = vld [vmem:[%s1578_s10 + $0x28] sm:$0xff] }
 0x111   :  { %v251_v8 = vmax.f32 %v194_v30, %v231_v7  ;;  %v1070_v9 = vpop.f32.mrb[29].mxu0  ;;  %v1443_v10 = vsel %vm275_vm5, %v266_v4, %v291_v5  ;;  %v972_v4 = vld [vmem:[%s1577_s6] ss:$0 sm:$0xff] }
 0x112   :  { %v234_v11 = vpop.f32.mrb[30].mxu0  ;;  %1087 = vmatprep.mubr.msk.f32.mxu1 %vm314_vm3, %v1443_v10  ;;  %v820_v5 = vld [vmem:[%s1578_s10] sm:$0xff] }
 0x113   :  { %v267_v12 = vadd.f32 %v1412_v44, %v251_v8  ;;  %v252_v13 = vmax.f32 %v199_v32, %v234_v11  ;;  %v1071_v14 = vpop.f32.mrb[31].mxu0  ;;  %v305_v32 = vld [vmem:[%s1572_s4] sm:$0xff]  ;;  %v1215_v9 = vpack.c.bf16 %v821_v6, %v820_v5  ;;  %v823_v11 = vld [vmem:[%s1578_s10 + $0x18] sm:$0xff] }
 0x114   :  { %v824_v14 = vld [vmem:[%s1578_s10 + $0x20] sm:$0xff] }
 0x115   :  { %v292_v16 = vmul.f32 %v1418_v49, %v267_v12  ;;  %v268_v17 = vadd.f32 %v1412_v44, %v252_v13  ;;  %vm276_vm6 = vcmp.ge.f32.partialorder %v267_v12, 0.0 }
 0x117   :  { %v301_v18 = vsel %vm276_vm6, %v267_v12, %v292_v16  ;;  %v293_v22 = vmul.f32 %v1418_v49, %v268_v17  ;;  %vm277_vm8 = vcmp.ge.f32.partialorder %v268_v17, 0.0  ;;  %v1221_v16 = vpack.c.bf16 %v825_v15, %v824_v14 }
 0x118   :  { %v239_v23 = vpop.f32.mrb[32].mxu0  ;;  %1088 = vmatmul.mubr.msk.f32.gmra.mrb[2].mxu1 %vm314_vm3, %v301_v18 }
 0x119   :  { %v253_v25 = vmax.f32 %v1401_v34, %v239_v23  ;;  %v1074_v26 = vpop.f32.mrb[33].mxu0  ;;  %1098 = vmatprep.mubr.msk.f32.mxu1 %vm314_vm3, %v299_v24  ;;  %v302_v34 = vsel %vm277_vm8, %v268_v17, %v293_v22  ;;  %v826_v17 = vld [vmem:[%s1578_s10 + $0x30] sm:$0xff]  ;;  %v975_v22 = vld [vmem:[%s1580_s9] ss:$0 sm:$0xff] }
 0x11a   :  { %v242_v27 = vpop.f32.mrb[34].mxu0 }
 0x11b   :  { %v269_v29 = vadd.f32 %v1412_v44, %v253_v25  ;;  %v254_v30 = vmax.f32 %v1403_v36, %v242_v27  ;;  %v1075_v31 = vpop.f32.mrb[35].mxu0  ;;  %v1194_v36 = vpack.c.bf16 %v306_v33, %v305_v32  ;;  %v976_v27 = vld [vmem:[%s1581_s11] ss:$0 sm:$0xff] }
 0x11c   :  { %1099 = vmatmul.mubr.msk.f32.vlgmr.msra.gmra.mrb[0].mxu1 %vm314_vm3, %v1443_v10 }
 0x11d   :  { %v294_v35 = vmul.f32 %v1418_v49, %v269_v29  ;;  %1189 = vmatpush3.bf16.msra.mxu1 %v1186_v3  ;;  %1101 = vmatprep.mubr.msk.f32.mxu1 %vm314_vm3, %v302_v34  ;;  %vm278_vm9 = vcmp.ge.f32.partialorder %v269_v29, 0.0  ;;  %v270_v37 = vadd.f32 %v1412_v44, %v254_v30  ;;  %v721_v44 = vld [vmem:[%s1575_s7] sm:$0xff] }
 0x11e   :  { %1191 = vmatprep.subr.bf16.mxu1 %v1190_v28 }
 0x11f   :  { %v303_v40 = vsel %vm278_vm9, %v269_v29, %v294_v35  ;;  %v295_v46 = vmul.f32 %v1418_v49, %v270_v37  ;;  %vm279_vm10 = vcmp.ge.f32.partialorder %v270_v37, 0.0  ;;  %v1203_v49 = vpack.c.bf16 %v722_v48, %v721_v44 }
 0x120   :  { %1102 = vmatmul.mubr.msk.f32.gmra.mrb[2].mxu1 %vm314_vm3, %v303_v40 }
 0x121   :  { %1193 = vmatpush3.bf16.msra.mxu1 %v1190_v28  ;;  %1112 = vmatprep.mubr.msk.f32.mxu1 %vm314_vm3, %v1443_v10  ;;  %v304_v20 = vsel %vm279_vm10, %v270_v37, %v295_v46 }
 0x122   :  { %1195 = vmatprep.subr.bf16.mxu1 %v1194_v36 }
 0x124   :  { %1113 = vmatmul.mubr.msk.f32.vlgmr.msra.gmra.mrb[0].mxu1 %vm314_vm3, %v301_v18 }
 0x125   :  { %1197 = vmatpush3.bf16.msra.mxu1 %v1194_v36  ;;  %1115 = vmatprep.mubr.msk.f32.mxu1 %vm314_vm3, %v303_v40 }
 0x126   :  { %1199 = vmatprep.subr.bf16.mxu1 %v1198_v45 }
 0x128   :  { %1116 = vmatmul.mubr.msk.f32.gmra.mrb[2].mxu1 %vm314_vm3, %v304_v20 }
 0x129   :  { %1201 = vmatpush3.bf16.msra.mxu1 %v1198_v45  ;;  %1126 = vmatprep.mubr.msk.f32.mxu1 %vm314_vm3, %v296_v38 }
 0x12a   :  { %1202 = vmatprep.subr.bf16.mxu1 %v1257_v39 }
 0x12c   :  { %1127 = vmatmul.mubr.msk.f32.vlgmr.msra.gmra.mrb[0].mxu1 %vm314_vm3, %v1429_v55  ;;  %v1209_v55 = vpack.c.bf16 %v726_v54, %v725_v53 }
 0x12d   :  { %1129 = vmatprep.mubr.msk.f32.mxu1 %vm314_vm3, %v299_v24  ;;  %1204 = vmatpush3.bf16.msra.mxu1 %v1203_v49 }
 0x12e   :  { %1205 = vmatprep.subr.bf16.mxu1 %v1257_v39 }
 0x130   :  { %1130 = vmatmul.mubr.msk.f32.gmra.mrb[2].mxu1 %vm314_vm3, %v1443_v10  ;;  %v822_v10 = vld [vmem:[%s1578_s10 + $0x10] sm:$0xff] }
 0x131   :  { %1148 = vmatprep.mubr.msk.f32.mxu1 %vm1256_vm0, %v1255_v0  ;;  %1207 = vmatpush3.bf16.msra.mxu1 %v1206_v52  ;;  %v1218_v13 = vpack.c.bf16 %v823_v11, %v822_v10 }
 0x132   :  { %1208 = vmatprep.subr.bf16.mxu1 %v1257_v39 }
 0x135   :  { %1210 = vmatpush3.bf16.msra.mxu1 %v1209_v55 }
 0x136   :  { %1211 = vmatprep.subr.bf16.mxu1 %v1257_v39 }
 0x139   :  { %1213 = vmatpush3.bf16.msra.mxu1 %v1212_v58 }
 0x13a   :  { %1214 = vmatprep.subr.bf16.mxu1 %v1257_v39 }
 0x1ff   :  { %v1128_v59 = vpop.f32.mrb[0].mxu1 }
 0x200   :  { %v673_v60 = vpop.f32.mrb[1].mxu1 }
 0x201   :  { %v700_v61 = vmax.f32 %v673_v60, %v1128_v59 }
 0x203   :  { %v1131_v62 = vpop.f32.mrb[2].mxu1 }
 0x204   :  { %v683_v63 = vpop.f32.mrb[3].mxu1 }
 0x205   :  { %v701_v1 = vmax.f32 %v683_v63, %v1131_v62 }
 0x207   :  { %v702_v3 = vmax.f32 %v700_v61, %v701_v1 }
 0x209   :  { %v710_v7 = vadd.f32 %v971_v2, %v702_v3 }
 0x20b   :  { %vm711_vm12 = vcmp.ge.f32.partialorder %v710_v7, 0.0  ;;  %v719_v8 = vmul.f32 %v972_v4, %v710_v7 }
 0x20d   :  { %v720_v12 = vsel %vm711_vm12, %v710_v7, %v719_v8 }
 0x20e   :  { %1149 = vmatmul.mubr.msk.f32.vlgmr.msra.gmra.mrb[4].mxu1 %vm736_vm13, %v720_v12 }
 0x20f   :  { %1216 = vmatpush3.bf16.msra.mxu1 %v1215_v9  ;;  %1167 = vmatprep.mubr.msk.f32.mxu1 %vm1256_vm0, %v1255_v0  ;;  %v827_v0 = vld [vmem:[%s1578_s10 + $0x38] sm:$0xff] }
 0x210   :  { %1217 = vmatprep.subr.bf16.mxu1 %v1257_v39  ;;  %v1224_v18 = vpack.c.bf16 %v827_v0, %v826_v17 }
 0x213   :  { %1219 = vmatpush3.bf16.msra.mxu1 %v1218_v13 }
 0x214   :  { %1220 = vmatprep.subr.bf16.mxu1 %v1257_v39 }
 0x217   :  { %1222 = vmatpush3.bf16.msra.mxu1 %v1221_v16 }
 0x218   :  { %1223 = vmatprep.subr.bf16.mxu1 %v1257_v39 }
 0x21b   :  { %1225 = vmatpush3.bf16.msra.mxu1 %v1224_v18 }
 0x2e1   :  { %v806_v21 = vpop.f32.mrb[4].mxu1 }
 0x2e2   :  { %v807_v23 = vadd.f32 %v973_v19, %v806_v21  ;;  %v1150_v24 = vpop.f32.mrb[5].mxu1 }
 0x2e4   :  { %vm810_vm14 = vcmp.ge.f32.partialorder %v807_v23, 0.0  ;;  %v818_v25 = vmul.f32 %v975_v22, %v807_v23 }
 0x2e6   :  { %v819_v26 = vsel %vm810_vm14, %v807_v23, %v818_v25 }
 0x2e7   :  { %1168 = vmatmul.mubr.msk.f32.vlgmr.msra.gmra.mrb[6].mxu1 %vm736_vm13, %v819_v26 }
 0x3ba   :  { %v904_v28 = vpop.f32.mrb[6].mxu1 }
 0x3bb   :  { %v905_v29 = vadd.f32 %v976_v27, %v904_v28  ;;  %v1169_v30 = vpop.f32.mrb[7].mxu1 }
 0x3bd   :  { %908 = vmax.xlane.f32.xlu0 %v905_v29 }
 0x44a   :  { %v909_v31 = vpop.xlane.xlu0 %908 }
 0x44b   :  { %v910_v32 = vsub.f32 %v905_v29, %v909_v31 }
 0x44d   :  { %v911_v33 = vmul.f32 1.442695, %v910_v32 }
 0x44f   :  { %1251 = vpow2.f32 %v911_v33 }
 0x459   :  { %v1252_v34 = vpop.eup %1251 }
 0x45a   :  { %913 = vadd.xlane.f32.xlu0 %v1252_v34 }
 0x4e7   :  { %v914_v35 = vpop.xlane.xlu0 %913 }
 0x4e8   :  { %1253 = vrcp.f32 %v914_v35 }
 0x4f2   :  { %v1254_v36 = vpop.eup %1253 }
 0x4f3   :  { %v916_v37 = vmul.f32 %v1254_v36, %v1252_v34 }
 0x4f5   :  { %917 = vst [vmem:[%s1582_s12] sm:$0xff] %v916_v37 }

</bundles_post_ra>
